<compile_context>
chip_gen: v7x
topology: tpu7x:2x2x1
jax: 0.10.0
libtpu: 0.0.40
codegen_flags: <defaults>
</compile_context>

<pallas_src>
import functools

import jax
import jax.numpy as jnp
from jax.experimental import pallas as pl
from jax.experimental.pallas import tpu as pltpu

HIDDEN = 128
NUM_CLASSES = 10
C_PAD = 128                       # class dim padded to a full lane width for the MXU
NEG_PAD = -1e30                   # finite "minus infinity" for padded logit columns
MAX_TILE_B = 1024                 # max batch rows per grid step
VMEM_X_BUDGET = 8 * 1024 * 1024   # bytes allowed for the double-buffered x tile
VMEM_LIMIT = 32 * 1024 * 1024     # scoped VMEM limit (safe on v5e/v6e/v7x)


# ---------------------------------------------------------------------------
# Kernels
# ---------------------------------------------------------------------------
def _forward_tile(x_ref, w1_ref, b1_ref, w2_ref, b2_ref):
    """Fused MLP forward for one (TB, D) batch tile -> (TB, C_PAD) f32 logits."""
    x = x_ref[...]
    if x.dtype != jnp.bfloat16:           # accept bf16 x natively, cast f32 in-kernel
        x = x.astype(jnp.bfloat16)
    # w1/w2 arrive pre-cast to bf16; biases stay f32.
    h = jnp.dot(x, w1_ref[...], preferred_element_type=jnp.float32) + b1_ref[...]
    h = jnp.maximum(h, 0.0)                                       # ReLU (f32, VPU)
    logits = jnp.dot(h.astype(jnp.bfloat16), w2_ref[...],
                     preferred_element_type=jnp.float32) + b2_ref[...]
    return logits                                                 # (TB, C_PAD) f32


def _mlp_logits_kernel(x_ref, w1_ref, b1_ref, w2_ref, b2_ref, out_ref):
    logits = _forward_tile(x_ref, w1_ref, b1_ref, w2_ref, b2_ref)
    nc = out_ref.shape[1]
    # Narrow in-VMEM slice; only the 10 real classes are written back to HBM.
    out_ref[...] = logits[:, :nc].astype(out_ref.dtype)


def _mlp_loss_kernel(x_ref, y_ref, w1_ref, b1_ref, w2_ref, b2_ref, nll_ref,
                     *, true_b):
    # Fused forward + per-row NLL; logits never leave VMEM/vregs.
    logits = _forward_tile(x_ref, w1_ref, b1_ref, w2_ref, b2_ref)
    tb, c = logits.shape
    m = jnp.max(logits, axis=-1, keepdims=True)      # padded cols are -1e30
    z = logits - m
    lse = jnp.log(jnp.sum(jnp.exp(z), axis=-1, keepdims=True))
    logp = z - lse                                   # log-softmax
    cls = jax.lax.broadcasted_iota(jnp.int32, (tb, c), 1)
    onehot = (cls == y_ref[...]).astype(jnp.float32)  # padded cols never selected
    nll = -jnp.sum(onehot * logp, axis=-1, keepdims=True)          # (TB, 1)
    # Mask padded batch rows so the wrapper can sum without slicing.
    row = (pl.program_id(0) * tb
           + jax.lax.broadcasted_iota(jnp.int32, (tb, 1), 0))
    nll_ref[...] = jnp.where(row < true_b, nll, 0.0)


# ---------------------------------------------------------------------------
# Wrapper helpers
# ---------------------------------------------------------------------------
def _round_up(n, m):
    return ((n + m - 1) // m) * m


def _batch_tiling(b, d, x_bytes):
    """Balanced batch tiles: <8 rows padding waste, VMEM-bounded, >=2 tiles
    for b > 256 so v7x's second TensorCore gets work."""
    vmem_cap = max(8, (VMEM_X_BUDGET // (2 * d * x_bytes)) // 8 * 8)
    max_tb = min(MAX_TILE_B, vmem_cap)
    n = max(pl.cdiv(b, max_tb), 2 if b > 256 else 1)
    tb = min(_round_up(pl.cdiv(b, n), 8), max_tb)
    g = pl.cdiv(b, tb)
    bp = g * tb
    return tb, bp, g


def _pad_batch(a, bp):
    b = a.shape[0]
    if bp == b:
        return a
    pad = [(0, bp - b)] + [(0, 0)] * (a.ndim - 1)
    return jnp.pad(a, pad)


def _pad_classes(w2, b2):
    """Pad class dim 10 -> 128; w2 cast to bf16 once here, bias stays f32."""
    c = w2.shape[1]
    w2p = jnp.zeros((w2.shape[0], C_PAD), jnp.bfloat16).at[:, :c].set(
        w2.astype(jnp.bfloat16))
    b2p = jnp.full((1, C_PAD), NEG_PAD, jnp.float32).at[:, :c].set(
        b2.reshape(1, -1).astype(jnp.float32))
    return w2p, b2p


def _const_map(i):
    return (0, 0)


# ---------------------------------------------------------------------------
# pallas_call wrappers
# ---------------------------------------------------------------------------
@jax.jit
def mlp_forward(x, w1, b1, w2, b2):
    b, d = x.shape
    c = w2.shape[1]
    tb, bp, g = _batch_tiling(b, d, x.dtype.itemsize)
    xp = _pad_batch(x, bp)
    w1b = w1.astype(jnp.bfloat16)             # cast once, VMEM-resident in kernel
    w2p, b2p = _pad_classes(w2, b2)

    logits = pl.pallas_call(
        _mlp_logits_kernel,
        out_shape=jax.ShapeDtypeStruct((bp, c), jnp.float32),   # narrow output
        grid=(g,),
        in_specs=[
            pl.BlockSpec((tb, d), lambda i: (i, 0)),            # x: batch-tiled
            pl.BlockSpec((d, HIDDEN), _const_map),              # weights resident
            pl.BlockSpec((1, HIDDEN), _const_map),
            pl.BlockSpec((HIDDEN, C_PAD), _const_map),
            pl.BlockSpec((1, C_PAD), _const_map),
        ],
        out_specs=pl.BlockSpec((tb, c), lambda i: (i, 0)),      # last dim == full dim
        compiler_params=pltpu.CompilerParams(
            dimension_semantics=("parallel",),
            vmem_limit_bytes=VMEM_LIMIT),
    )(xp, w1b, b1, w2p, b2p)
    return logits if bp == b else logits[:b]


@jax.jit
def mlp_loss(x, y, w1, b1, w2, b2):
    b, d = x.shape
    tb, bp, g = _batch_tiling(b, d, x.dtype.itemsize)
    xp = _pad_batch(x, bp)
    yp = _pad_batch(y.astype(jnp.int32).reshape(-1, 1), bp)
    w1b = w1.astype(jnp.bfloat16)
    w2p, b2p = _pad_classes(w2, b2)

    nll = pl.pallas_call(
        functools.partial(_mlp_loss_kernel, true_b=b),
        out_shape=jax.ShapeDtypeStruct((bp, 1), jnp.float32),
        grid=(g,),
        in_specs=[
            pl.BlockSpec((tb, d), lambda i: (i, 0)),            # x: batch-tiled
            pl.BlockSpec((tb, 1), lambda i: (i, 0)),            # y: batch-tiled
            pl.BlockSpec((d, HIDDEN), _const_map),              # weights resident
            pl.BlockSpec((1, HIDDEN), _const_map),
            pl.BlockSpec((HIDDEN, C_PAD), _const_map),
            pl.BlockSpec((1, C_PAD), _const_map),
        ],
        out_specs=pl.BlockSpec((tb, 1), lambda i: (i, 0)),
        compiler_params=pltpu.CompilerParams(
            dimension_semantics=("parallel",),
            vmem_limit_bytes=VMEM_LIMIT),
    )(xp, yp, w1b, b1, w2p, b2p)
    # Padded rows are masked to exactly 0 inside the kernel -> plain sum.
    return jnp.sum(nll) / b


def torch_model_forward(params, x, y=None):
    """Mirrors TorchModel.forward: returns loss if y is given, else logits."""
    w1, b1, w2, b2 = params
    if y is not None:
        return mlp_loss(x, y, w1, b1, w2, b2)
    return mlp_forward(x, w1, b1, w2, b2)


def init_params(key, input_size):
    # PyTorch-Linear-style uniform(+-1/sqrt(fan_in)) init, deterministic.
    k1, k2, k3, k4 = jax.random.split(key, 4)
    lim1 = 1.0 / jnp.sqrt(jnp.float32(input_size))
    lim2 = 1.0 / jnp.sqrt(jnp.float32(HIDDEN))
    w1 = jax.random.uniform(k1, (input_size, HIDDEN), jnp.float32, -lim1, lim1)
    b1 = jax.random.uniform(k2, (1, HIDDEN), jnp.float32, -lim1, lim1)
    w2 = jax.random.uniform(k3, (HIDDEN, NUM_CLASSES), jnp.float32, -lim2, lim2)
    b2 = jax.random.uniform(k4, (1, NUM_CLASSES), jnp.float32, -lim2, lim2)
    return w1, b1, w2, b2


if __name__ == "__main__":
    key = jax.random.PRNGKey(0)
    kx, ky, kp = jax.random.split(key, 3)

    batch, input_size = 8, 32
    x = jax.random.normal(kx, (batch, input_size), jnp.float32)
    y = jax.random.randint(ky, (batch,), 0, NUM_CLASSES, jnp.int32)
    params = init_params(kp, input_size)

    # Inference path (y=None): logits
    logits = jax.block_until_ready(torch_model_forward(params, x))
    # Training path (y given): fused cross-entropy loss
    loss = jax.block_until_ready(torch_model_forward(params, x, y))

    # Reference in plain JAX with matching bf16-operand / f32-accumulate matmuls.
    # TODO(synk): exact f32 Linear parity would need f32 MXU dots (slower); bf16
    # operands deviate ~1e-2 relative from PyTorch's f32 semantics.
    w1, b1, w2, b2 = params
    h_ref = jnp.maximum(
        jnp.dot(x.astype(jnp.bfloat16), w1.astype(jnp.bfloat16),
                preferred_element_type=jnp.float32) + b1, 0.0)
    logits_ref = jnp.dot(h_ref.astype(jnp.bfloat16), w2.astype(jnp.bfloat16),
                         preferred_element_type=jnp.float32) + b2
    logp_ref = jax.nn.log_softmax(logits_ref, axis=-1)
    loss_ref = -jnp.mean(logp_ref[jnp.arange(batch), y])

    # Pure-f32 reference for semantic sanity (looser tol: bf16 matmuls inside).
    logits_f32 = jnp.maximum(x @ w1 + b1, 0.0) @ w2 + b2

    assert logits.shape == (batch, NUM_CLASSES)
    assert jnp.allclose(logits, logits_ref, atol=1e-2, rtol=1e-2)
    assert jnp.allclose(loss, loss_ref, atol=1e-2, rtol=1e-2)
    assert jnp.allclose(logits, logits_f32, atol=6e-2, rtol=6e-2)

    print("KERNEL_OK")
</pallas_src>

<mosaic_0001>
module attributes {stable_mosaic.version = 11 : i64} {
  func.func @_mlp_logits_kernel(%arg0: i32, %arg1: memref<8x32xf32, #tpu.memory_space<vmem>>, %arg2: memref<32x128xbf16, #tpu.memory_space<vmem>>, %arg3: memref<1x128xf32, #tpu.memory_space<vmem>>, %arg4: memref<128x128xbf16, #tpu.memory_space<vmem>>, %arg5: memref<1x128xf32, #tpu.memory_space<vmem>>, %arg6: memref<8x10xf32, #tpu.memory_space<vmem>>) attributes {dimension_semantics = [#tpu.dimension_semantics<parallel>], iteration_bounds = array<i64: 1>, scalar_prefetch = 0 : i64, scratch_operands = 0 : i64, tpu.core_type = #tpu.core_type<tc>, window_params = [{transform_indices = @transform_0, window_bounds = array<i64: 8, 32>}, {pipeline_mode = #tpu.pipeline_mode<synchronous>, transform_indices = @transform_1, window_bounds = array<i64: 32, 128>}, {pipeline_mode = #tpu.pipeline_mode<synchronous>, transform_indices = @transform_2, window_bounds = array<i64: 1, 128>}, {pipeline_mode = #tpu.pipeline_mode<synchronous>, transform_indices = @transform_3, window_bounds = array<i64: 128, 128>}, {pipeline_mode = #tpu.pipeline_mode<synchronous>, transform_indices = @transform_4, window_bounds = array<i64: 1, 128>}, {transform_indices = @transform_5, window_bounds = array<i64: 8, 10>}]} {
    %c0 = arith.constant 0 : index
    %c0_0 = arith.constant 0 : index
    %0 = vector.load %arg1[%c0, %c0_0] : memref<8x32xf32, #tpu.memory_space<vmem>>, vector<8x32xf32>
    %1 = arith.truncf %0 : vector<8x32xf32> to vector<8x32xbf16>
    %c0_1 = arith.constant 0 : index
    %c0_2 = arith.constant 0 : index
    %2 = vector.load %arg2[%c0_1, %c0_2] : memref<32x128xbf16, #tpu.memory_space<vmem>>, vector<32x128xbf16>
    %cst = arith.constant dense<0.000000e+00> : vector<8x128xf32>
    %3 = tpu.matmul %1, %2, %cst {dimension_numbers = #tpu.dot_dimension_numbers<[1], [0], [0], [1], [0, 0, 1, 1], [], []>} : vector<8x32xbf16>, vector<32x128xbf16>, vector<8x128xf32> -> vector<8x128xf32>
    %c0_3 = arith.constant 0 : index
    %c0_4 = arith.constant 0 : index
    %4 = vector.load %arg3[%c0_3, %c0_4] : memref<1x128xf32, #tpu.memory_space<vmem>>, vector<1x128xf32>
    %5 = vector.broadcast %4 : vector<1x128xf32> to vector<8x128xf32>
    %6 = arith.addf %3, %5 : vector<8x128xf32>
    %cst_5 = arith.constant 0.000000e+00 : f32
    %7 = vector.broadcast %cst_5 : f32 to vector<8x128xf32>
    %8 = arith.maximumf %6, %7 : vector<8x128xf32>
    %9 = arith.truncf %8 : vector<8x128xf32> to vector<8x128xbf16>
    %c0_6 = arith.constant 0 : index
    %c0_7 = arith.constant 0 : index
    %10 = vector.load %arg4[%c0_6, %c0_7] : memref<128x128xbf16, #tpu.memory_space<vmem>>, vector<128x128xbf16>
    %cst_8 = arith.constant dense<0.000000e+00> : vector<8x128xf32>
    %11 = tpu.matmul %9, %10, %cst_8 {dimension_numbers = #tpu.dot_dimension_numbers<[1], [0], [0], [1], [0, 0, 1, 1], [], []>} : vector<8x128xbf16>, vector<128x128xbf16>, vector<8x128xf32> -> vector<8x128xf32>
    %c0_9 = arith.constant 0 : index
    %c0_10 = arith.constant 0 : index
    %12 = vector.load %arg5[%c0_9, %c0_10] : memref<1x128xf32, #tpu.memory_space<vmem>>, vector<1x128xf32>
    %13 = vector.broadcast %12 : vector<1x128xf32> to vector<8x128xf32>
    %14 = arith.addf %11, %13 : vector<8x128xf32>
    %15 = vector.extract_strided_slice %14 {offsets = [0, 0], sizes = [8, 10], strides = [1, 1]} : vector<8x128xf32> to vector<8x10xf32>
    %c0_11 = arith.constant 0 : index
    %c0_12 = arith.constant 0 : index
    %16 = vector.load %arg6[%c0_11, %c0_12] : memref<8x10xf32, #tpu.memory_space<vmem>>, vector<8x10xf32>
    tpu.vector_store %arg6[%c0_11, %c0_12], %15 {strides = array<i32>} : memref<8x10xf32, #tpu.memory_space<vmem>>, vector<8x10xf32>,
    return
  }
  func.func @transform_0(%arg0: i32) -> (i32, i32) {
    %c0_i32 = arith.constant 0 : i32
    %c0_i32_0 = arith.constant 0 : i32
    return %arg0, %c0_i32 : i32, i32
  }
  func.func @transform_1(%arg0: i32) -> (i32, i32) {
    %c0_i32 = arith.constant 0 : i32
    %c0_i32_0 = arith.constant 0 : i32
    %c0_i32_1 = arith.constant 0 : i32
    return %c0_i32, %c0_i32_0 : i32, i32
  }
  func.func @transform_2(%arg0: i32) -> (i32, i32) {
    %c0_i32 = arith.constant 0 : i32
    %c0_i32_0 = arith.constant 0 : i32
    %c0_i32_1 = arith.constant 0 : i32
    return %c0_i32, %c0_i32_0 : i32, i32
  }
  func.func @transform_3(%arg0: i32) -> (i32, i32) {
    %c0_i32 = arith.constant 0 : i32
    %c0_i32_0 = arith.constant 0 : i32
    %c0_i32_1 = arith.constant 0 : i32
    return %c0_i32, %c0_i32_0 : i32, i32
  }
  func.func @transform_4(%arg0: i32) -> (i32, i32) {
    %c0_i32 = arith.constant 0 : i32
    %c0_i32_0 = arith.constant 0 : i32
    %c0_i32_1 = arith.constant 0 : i32
    return %c0_i32, %c0_i32_0 : i32, i32
  }
  func.func @transform_5(%arg0: i32) -> (i32, i32) {
    %c0_i32 = arith.constant 0 : i32
    %c0_i32_0 = arith.constant 0 : i32
    return %arg0, %c0_i32 : i32, i32
  }
}

</mosaic_0001>

<bundles_post_ra>
// kernel: mlp_forward.1
= control target key start
LH: loop header
LB: loop body
LE: loop exit
PB: predicated region body
PF: predicated region fallthrough
CT: control target
= control target key end

     0   :  { %v310_v1 = vmov 0.0   ;;  %vm311_vm0 = vmmov 0   ;;  %vm47_vm1 = vcmask 261120   ;;  %s394_s0 = inlined_call_operand.vmem [shape: f32[8,32], index: 0, kind: input, shape index: {}]   ;;  %s395_s1 = inlined_call_operand.vmem [shape: bf16[32,128], index: 1, kind: input, shape index: {}]   ;;  %s396_s2 = inlined_call_operand.vmem [shape: f32[1,128], index: 2, kind: input, shape index: {}]   ;;  %s397_s3 = inlined_call_operand.vmem [shape: bf16[128,128], index: 3, kind: input, shape index: {}]   ;;  %s398_s4 = inlined_call_operand.vmem [shape: f32[1,128], index: 4, kind: input, shape index: {}]   ;;  %s399_s5 = inlined_call_operand.hbm [shape: f32[8,10], index: 5, kind: output, shape index: {}]  }
   0x1   :  { %v276_v0 = vld [vmem:[%s395_s1] sm:$0xff]   ;;  %245 = vmatprep.subr.bf16.mxu0 %v310_v1  ;;  %v277_v2 = vld [vmem:[%s395_s1 + $0x8] sm:$0xff]   ;;  %253 = vmatprep.subr.bf16.mxu1 %v310_v1  ;;  %v280_v7 = vld [vmem:[%s397_s3 + $0x10] sm:$0xff]  }
   0x2   :  { %246 = vmatpush3.bf16.msra.mxu0 %v276_v0  ;;  %249 = vmatprep.mubr.msk.bf16.mxu0 %vm311_vm0, %v310_v1  ;;  %v22_v3 = vld [vmem:[%s394_s0] sm:$0xff]  ;;  %v279_v6 = vld [vmem:[%s397_s3 + $0x8] sm:$0xff]  }
   0x3   :  { %247 = vmatprep.subr.bf16.mxu0 %v310_v1  ;;  %v278_v4 = vld [vmem:[%s397_s3] sm:$0xff]   ;;  %269 = vmatprep.mubr.msk.bf16.mxu1 %vm311_vm0, %v310_v1  ;;  %v23_v5 = vpack.c.bf16 %v22_v3, %v22_v3 }
   0x4   :  { %254 = vmatpush3.bf16.msra.mxu1 %v278_v4 }
   0x5   :  { %255 = vmatprep.subr.bf16.mxu1 %v310_v1 }
   0x6   :  { %248 = vmatpush3.bf16.msra.mxu0 %v277_v2 }
   0x8   :  { %256 = vmatpush3.bf16.msra.mxu1 %v279_v6 }
   0x9   :  { %250 = vmatmul.mubr.msk.bf16.vlgmr.msra.gmra.mrb[0].mxu0 %vm47_vm1, %v23_v5  ;;  %257 = vmatprep.subr.bf16.mxu1 %v310_v1 }
   0xa   :  { %10 = vsyncpa [#allocation3], 0  ;;  %v281_v8 = vld [vmem:[%s397_s3 + $0x18] sm:$0xff]   ;;  %v282_v9 = vld [vmem:[%s397_s3 + $0x20] sm:$0xff]   ;;  %s312_s17 = smov [#allocation2]   ;;  %vm204_vm2 = vcmask 80896  }
   0xb   :  { %v283_v10 = vld [vmem:[%s397_s3 + $0x28] sm:$0xff]   ;;  %v284_v11 = vld [vmem:[%s397_s3 + $0x30] sm:$0xff]   ;;  %v285_v12 = vld [vmem:[%s397_s3 + $0x38] sm:$0xff]   ;;  %s212_s18 = sshll.u32 %s312_s17, 4  ;;  %s213_s18 = int_to_ptr.vmem [resolvable:$true] %s212_s18 }
   0xc   :  { %258 = vmatpush3.bf16.msra.mxu1 %v280_v7  ;;  %v220_v13 = vld [vmem:[%s396_s2] ss:$0 sm:$0xff]  ;;  %s286_s2 = scalar_lea.vmem %s213_s18, 128  ;;  %p291_p1 = scmp.lt.s32.totalorder %s213_s18, %s213_s18 }
   0xd   :  { %259 = vmatprep.subr.bf16.mxu1 %v310_v1  ;;  %v224_v21 = vld [vmem:[%s398_s4] ss:$0 sm:$0xff]  ;;  %p287_p0 = scmp.ne.s32.totalorder %s213_s18, %s286_s2  ;;  %p292_p2 = scmp.lt.s32.totalorder %s286_s2, %s286_s2 }
   0xf   :  { %p293_p3 = por %p292_p2, %p291_p1 }
  0x10   :  { %260 = vmatpush3.bf16.msra.mxu1 %v281_v8 }
  0x11   :  { %261 = vmatprep.subr.bf16.mxu1 %v310_v1  ;;  %p294_p4 = pnand %p293_p3, %p287_p0 }
  0x14   :  { %262 = vmatpush3.bf16.msra.mxu1 %v282_v9 }
  0x15   :  { %263 = vmatprep.subr.bf16.mxu1 %v310_v1 }
  0x18   :  { %264 = vmatpush3.bf16.msra.mxu1 %v283_v10 }
  0x19   :  { %265 = vmatprep.subr.bf16.mxu1 %v310_v1 }
  0x1c   :  { %266 = vmatpush3.bf16.msra.mxu1 %v284_v11 }
  0x1d   :  { %267 = vmatprep.subr.bf16.mxu1 %v310_v1 }
  0x20   :  { %268 = vmatpush3.bf16.msra.mxu1 %v285_v12 }
  0xdc   :  { %v85_v14 = vpop.f32.mrb[0].mxu0 }
  0xdd   :  { %v86_v15 = vadd.f32 %v220_v13, %v85_v14  ;;  %v251_v16 = vpop.f32.mrb[1].mxu0 }
  0xde   :  { %v88_v17 = vpop.f32.mrb[2].mxu0 }
  0xdf   :  { %v91_v18 = vmax.f32 %v86_v15, 0.0  ;;  %v252_v19 = vpop.f32.mrb[3].mxu0 }
  0xe1   :  { %v92_v20 = vpack.c.bf16 %v91_v18, %v91_v18 }
  0xe3   :  { %270 = vmatmul.mubr.bf16.vlgmr.msra.gmra.mrb[0].mxu1 %v92_v20 }
 0x1b6   :  { %v198_v22 = vpop.f32.mrb[0].mxu1 }
 0x1b7   :  { %v199_v23 = vadd.f32 %v224_v21, %v198_v22  ;;  %v271_v24 = vpop.f32.mrb[1].mxu1 }
 0x1b8   :  { %v201_v25 = vpop.f32.mrb[2].mxu1 }
 0x1b9   :  { %v272_v26 = vpop.f32.mrb[3].mxu1  ;;  %205 = vst.msk [vmem:[#allocation2] sm:$0xff] %vm204_vm2, %v199_v23 }
 0x1ba   :  { %297 = shalt.err (!%p294_p4)
}
 0x1bb   :  { %s298_s4 = scalar_lea.hbm %s399_s5, 128 }
 0x1bc   :  { %p299_p5 = scmp.ne.s32.totalorder %s399_s5, %s298_s4  ;;  %p302_p6 = scmp.lt.u32.totalorder %s298_s4, %s399_s5 }
 0x1be   :  { %p304_p7 = pnand %p302_p6, %p299_p5 }
 0x1c0   :  { %307 = shalt.err (!%p304_p7)
}
 0x1c1   :  { %215 = dma.vmem_to_hbm [thread:$0]  %s213_s18, 128, %s399_s5, [#allocation3]  }
 0x1c2   :  { %308 = dma.done.wait [#allocation3], 128  }
 0x1c3   :  { %309 = vsyncadd [#allocation3], 4294967168 }
 0x1c4   :  { %219 = vsyncpa [#allocation3], 1 }

</bundles_post_ra>
